<compile_context>
chip_gen: v7x
topology: tpu7x:2x2x1
jax: 0.10.0
libtpu: 0.0.40
codegen_flags: <defaults>
</compile_context>

<pallas_src>
import functools

import jax
import jax.numpy as jnp
import numpy as np
from jax.experimental import pallas as pl
from jax.experimental.pallas import tpu as pltpu


# --------------------------------------------------------------------------
# Pallas kernel: b_tile batch elements per grid step, whole block fused.
# --------------------------------------------------------------------------
def _bottleneck_kernel(*refs, k, pad, stride, lout, has_shortcut):
    if has_shortcut:
        (x_ref, w1_ref, c1_ref, w2_ref, c2_ref, w3_ref, c3_ref, ws_ref,
         out_ref, h1p_ref) = refs
    else:
        (x_ref, w1_ref, c1_ref, w2_ref, c2_ref, w3_ref, c3_ref,
         out_ref, h1p_ref) = refs

    B, L, Cin = x_ref.shape
    Chp = w1_ref.shape[1]
    Coutp = out_ref.shape[2]

    x_f32 = x_ref[...]                                        # (B, L, Cin) f32
    x2d_bf = x_f32.reshape(B * L, Cin).astype(jnp.bfloat16)

    # conv1 (1x1; bn1 scale pre-folded into w1) + bias + relu.
    h1 = jnp.dot(x2d_bf, w1_ref[...], preferred_element_type=jnp.float32)
    h1 = jnp.maximum(h1 + c1_ref[...], 0.0)                   # (B*L, Chp) f32

    # Stage padded h1 in VMEM; only the 2*pad halo rows are zeroed (cheap).
    if pad > 0:
        zhalo = jnp.zeros((B, pad, Chp), jnp.float32)
        h1p_ref[:, pl.ds(0, pad), :] = zhalo
        h1p_ref[:, pl.ds(pad + L, pad), :] = zhalo
    h1p_ref[:, pl.ds(pad, L), :] = h1.reshape(B, L, Chp)

    # conv2 (k-tap, strided) + bias + relu — one 3-D (strided) slice per tap, taps
    # concatenated along the lane-aligned contraction axis -> ONE MXU matmul, K=k*Chp.
    def tap_slice(t):
        if stride > 1:
            return h1p_ref[:, pl.ds(t, lout, stride=stride), :]
        return h1p_ref[:, pl.ds(t, lout), :]

    taps = [tap_slice(t).astype(jnp.bfloat16) for t in range(k)]   # each (B, lout, Chp)
    tap_cat = jnp.concatenate(taps, axis=-1).reshape(B * lout, k * Chp)
    h2 = jnp.dot(tap_cat, w2_ref[...], preferred_element_type=jnp.float32)
    h2 = jnp.maximum(h2 + c2_ref[...], 0.0).astype(jnp.bfloat16)   # (B*lout, Chp)

    # conv3 (1x1; bn3 scale folded into w3); bias already includes the shortcut bias.
    h3 = jnp.dot(h2, w3_ref[...], preferred_element_type=jnp.float32) + c3_ref[...]

    # Residual branch.
    if has_shortcut:
        if stride > 1:
            xs_bf = (x_ref[:, pl.ds(0, lout, stride=stride), :]
                     .astype(jnp.bfloat16).reshape(B * lout, Cin))
        else:
            xs_bf = x2d_bf
        y = h3 + jnp.dot(xs_bf, ws_ref[...], preferred_element_type=jnp.float32)
    else:
        # Identity shortcut (stride==1, Cin==Cout==Coutp): exact f32 add, no matmul.
        y = h3 + x_f32.reshape(B * L, Cin)

    out_ref[...] = jnp.maximum(y, 0.0).reshape(B, lout, Coutp).astype(out_ref.dtype)


# --------------------------------------------------------------------------
# Wrapper: NCL in / NCL out; folds BN scales into bf16 weights, pads channels
# where needed, tiles the batch, and calls pallas_call.
# --------------------------------------------------------------------------
def bottleneck1d_3(x_ncl, params, *, stride, kernel_size, b_tile=None):
    N, Cin, L = x_ncl.shape
    Ch = params["w1"].shape[1]
    Cout = params["w3"].shape[1]
    k = kernel_size
    pad = (k - 1) // 2
    Lout = (L + 2 * pad - k) // stride + 1
    has_shortcut = "ws" in params
    if not has_shortcut:
        assert stride == 1 and Cin == Cout, (
            "identity shortcut requires stride==1 and in_channels==out_channels")

    rup = lambda v, m: ((v + m - 1) // m) * m
    Chp = rup(Ch, 128)
    # Lane-dense output when the shortcut is a conv; identity path keeps Cout exact so
    # the f32 residual add needs no in-kernel channel padding.
    Coutp = rup(Cout, 128) if has_shortcut else Cout

    # Batch tile: aim for 256-512 matmul rows per grid step; only split across the two
    # v7x TensorCores when each half still gets >= 256 rows.
    if b_tile is None:
        rows_target, min_core_rows = 512, 256
        b_tile = max(1, min(N, pl.cdiv(rows_target, L)))
        if b_tile >= N and N >= 2 and (N * L) // 2 >= min_core_rows:
            b_tile = pl.cdiv(N, 2)
    Npad = pl.cdiv(N, b_tile) * b_tile

    # Boundary glue: channels-last; batch pad only (x channels stay un-padded — a block
    # last dim equal to the full array dim is legal and saves 8x HBM traffic for tiny Cin).
    x = jnp.transpose(x_ncl, (0, 2, 1)).astype(jnp.float32)        # (N, L, Cin)
    if Npad != N:
        x = jnp.pad(x, ((0, Npad - N), (0, 0), (0, 0)))

    f32 = lambda a: a.astype(jnp.float32)
    padvec = lambda v, c: jnp.pad(v.reshape(1, -1),
                                  ((0, 0), (0, c - v.shape[-1]))).astype(jnp.float32)

    # Fold BN scales into the weights IN F32, then cast to bf16 (per review).
    w1 = jnp.pad(f32(params["w1"]) * params["a1"][None, :],
                 ((0, 0), (0, Chp - Ch))).astype(jnp.bfloat16)          # (Cin, Chp)
    c1 = padvec(params["c1"], Chp)

    w2 = f32(params["w2"]) * params["a2"][None, None, :]                # (k, Ch, Ch)
    w2 = jnp.pad(w2, ((0, 0), (0, Chp - Ch), (0, Chp - Ch)))
    w2 = w2.reshape(k * Chp, Chp).astype(jnp.bfloat16)                  # (k*Chp, Chp)
    c2 = padvec(params["c2"], Chp)

    w3 = jnp.pad(f32(params["w3"]) * params["a3"][None, :],
                 ((0, Chp - Ch), (0, Coutp - Cout))).astype(jnp.bfloat16)  # (Chp, Coutp)
    c3 = params["c3"] + params["cs"] if has_shortcut else params["c3"]
    c3 = padvec(c3, Coutp)

    inputs = [x, w1, c1, w2, c2, w3, c3]
    full = lambda shape: pl.BlockSpec(shape, lambda b: (0,) * len(shape))
    in_specs = [
        pl.BlockSpec((b_tile, L, Cin), lambda b: (b, 0, 0)),            # x
        full((Cin, Chp)), full((1, Chp)),                               # w1, c1
        full((k * Chp, Chp)), full((1, Chp)),                           # w2, c2
        full((Chp, Coutp)), full((1, Coutp)),                           # w3, c3(+cs)
    ]
    if has_shortcut:
        ws = jnp.pad(f32(params["ws"]),
                     ((0, 0), (0, Coutp - Cout))).astype(jnp.bfloat16)  # (Cin, Coutp)
        inputs.append(ws)
        in_specs.append(full((Cin, Coutp)))

    grid_spec = pltpu.PrefetchScalarGridSpec(
        num_scalar_prefetch=0,
        grid=(Npad // b_tile,),
        in_specs=in_specs,
        out_specs=pl.BlockSpec((b_tile, Lout, Coutp), lambda b: (b, 0, 0)),
        scratch_shapes=[pltpu.VMEM((b_tile, L + 2 * pad, Chp), jnp.float32)],
    )

    out = pl.pallas_call(
        functools.partial(_bottleneck_kernel, k=k, pad=pad, stride=stride,
                          lout=Lout, has_shortcut=has_shortcut),
        out_shape=jax.ShapeDtypeStruct((Npad, Lout, Coutp), jnp.float32),
        grid_spec=grid_spec,
        compiler_params=pltpu.CompilerParams(dimension_semantics=("parallel",)),
    )(*inputs)

    # Strip channel/batch padding and return PyTorch's (N, Cout, Lout) layout.
    return jnp.transpose(out[:N, :, :Cout], (0, 2, 1))


# --------------------------------------------------------------------------
# Deterministic synthetic parameters (mirrors the nn.Module shapes), with
# conv-bias + inference-mode BatchNorm folded into per-channel (a, c) affines.
# --------------------------------------------------------------------------
def make_params(key, in_ch, hid_ch, out_ch, kernel_size, stride, eps=1e-5):
    ks = jax.random.split(key, 12)
    nrm = lambda k, s, sc=0.1: (sc * jax.random.normal(k, s)).astype(jnp.float32)
    uni = lambda k, s: jax.random.uniform(k, s, minval=0.5, maxval=1.5).astype(jnp.float32)

    w1_t = nrm(ks[0], (hid_ch, in_ch, 1));            b1 = nrm(ks[1], (hid_ch,))
    w2_t = nrm(ks[2], (hid_ch, hid_ch, kernel_size)); b2 = nrm(ks[3], (hid_ch,))
    w3_t = nrm(ks[4], (out_ch, hid_ch, 1));           b3 = nrm(ks[5], (out_ch,))

    def bn(kk, c):
        k4 = jax.random.split(kk, 4)
        return uni(k4[0], (c,)), nrm(k4[1], (c,)), nrm(k4[2], (c,)), uni(k4[3], (c,))

    g1, be1, m1, v1 = bn(ks[6], hid_ch)
    g2, be2, m2, v2 = bn(ks[7], hid_ch)
    g3, be3, m3, v3 = bn(ks[8], out_ch)

    def fold(gamma, beta, mean, var, conv_bias):
        a = gamma / jnp.sqrt(var + eps)
        return a, conv_bias * a + beta - mean * a

    a1, c1 = fold(g1, be1, m1, v1, b1)
    a2, c2 = fold(g2, be2, m2, v2, b2)
    a3, c3 = fold(g3, be3, m3, v3, b3)

    p = dict(
        w1=jnp.transpose(w1_t[:, :, 0], (1, 0)), a1=a1, c1=c1,   # (Cin, Ch)
        w2=jnp.transpose(w2_t, (2, 1, 0)),        a2=a2, c2=c2,  # (k, Ch_in, Ch_out)
        w3=jnp.transpose(w3_t[:, :, 0], (1, 0)), a3=a3, c3=c3,   # (Ch, Cout)
    )
    if stride != 1 or in_ch != out_ch:
        ws_t = nrm(ks[9], (out_ch, in_ch, 1)); bs = nrm(ks[10], (out_ch,))
        p["ws"] = jnp.transpose(ws_t[:, :, 0], (1, 0))           # (Cin, Cout)
        p["cs"] = bs
    return p


# --------------------------------------------------------------------------
# Pure-JAX reference mirroring the kernel's precision choices (f32 affine fold,
# bf16 matmul inputs, f32 accumulation) — a tight structural check.
# --------------------------------------------------------------------------
def ref_forward(x_ncl, p, *, stride, kernel_size):
    k = kernel_size
    pad = (k - 1) // 2
    foldw = lambda w, a: (w.astype(jnp.float32) * a).astype(jnp.bfloat16)
    w1 = foldw(p["w1"], p["a1"][None, :])
    w2 = foldw(p["w2"], p["a2"][None, None, :])
    w3 = foldw(p["w3"], p["a3"][None, :])
    mm = lambda a, b: jnp.einsum("nlc,cd->nld", a.astype(jnp.bfloat16), b,
                                 preferred_element_type=jnp.float32)

    x = jnp.transpose(x_ncl, (0, 2, 1)).astype(jnp.float32)      # (N, L, Cin)
    N, L, _ = x.shape
    Lout = (L + 2 * pad - k) // stride + 1

    h1 = jnp.maximum(mm(x, w1) + p["c1"], 0.0)
    h1p = jnp.pad(h1, ((0, 0), (pad, pad), (0, 0)))
    acc = jnp.zeros((N, Lout, w2.shape[2]), jnp.float32)
    for t in range(k):
        tap = h1p[:, t:t + (Lout - 1) * stride + 1:stride, :]
        acc = acc + mm(tap, w2[t])
    h2 = jnp.maximum(acc + p["c2"], 0.0)
    h3 = mm(h2, w3) + p["c3"]

    xs = x[:, :(Lout - 1) * stride + 1:stride, :]
    if "ws" in p:
        y = mm(xs, p["ws"].astype(jnp.bfloat16)) + p["cs"]
    else:
        y = xs
    return jnp.transpose(jnp.maximum(h3 + y, 0.0), (0, 2, 1))


if __name__ == "__main__":
    key = jax.random.PRNGKey(0)
    k1, k2, k3, k4 = jax.random.split(key, 4)

    # Config 1: BottleNeck1d_3(in=16, hidden=32, out=64, stride=2, k=3) — conv shortcut.
    N, Cin, Ch, Cout, L = 2, 16, 32, 64, 16
    stride, ksz = 2, 3
    x1 = jax.random.normal(k1, (N, Cin, L), dtype=jnp.float32)
    p1 = make_params(k2, Cin, Ch, Cout, ksz, stride)
    out1 = jax.block_until_ready(bottleneck1d_3(x1, p1, stride=stride, kernel_size=ksz))
    ref1 = ref_forward(x1, p1, stride=stride, kernel_size=ksz)
    np.testing.assert_allclose(np.asarray(out1), np.asarray(ref1), rtol=1e-2, atol=1e-2)
    Lout1 = (L + 2 * ((ksz - 1) // 2) - ksz) // stride + 1
    assert out1.shape == (N, Cout, Lout1)

    # Config 2: identity shortcut (stride=1, Cin==Cout), 2 batch elems fused per step.
    Cin2, Ch2, Cout2, stride2 = 64, 32, 64, 1
    x2 = jax.random.normal(k3, (N, Cin2, L), dtype=jnp.float32)
    p2 = make_params(k4, Cin2, Ch2, Cout2, ksz, stride2)
    out2 = jax.block_until_ready(
        bottleneck1d_3(x2, p2, stride=stride2, kernel_size=ksz, b_tile=2))
    ref2 = ref_forward(x2, p2, stride=stride2, kernel_size=ksz)
    np.testing.assert_allclose(np.asarray(out2), np.asarray(ref2), rtol=1e-2, atol=1e-2)
    assert out2.shape == (N, Cout2, L)

    print("KERNEL_OK")
</pallas_src>

<mosaic_0001>
module attributes {stable_mosaic.version = 11 : i64} {
  func.func @_bottleneck_kernel(%arg0: i32, %arg1: memref<2x16x16xf32, #tpu.memory_space<vmem>>, %arg2: memref<16x128xbf16, #tpu.memory_space<vmem>>, %arg3: memref<1x128xf32, #tpu.memory_space<vmem>>, %arg4: memref<384x128xbf16, #tpu.memory_space<vmem>>, %arg5: memref<1x128xf32, #tpu.memory_space<vmem>>, %arg6: memref<128x128xbf16, #tpu.memory_space<vmem>>, %arg7: memref<1x128xf32, #tpu.memory_space<vmem>>, %arg8: memref<16x128xbf16, #tpu.memory_space<vmem>>, %arg9: memref<2x8x128xf32, #tpu.memory_space<vmem>>, %arg10: memref<2x18x128xf32, #tpu.memory_space<vmem>>) attributes {dimension_semantics = [#tpu.dimension_semantics<parallel>], iteration_bounds = array<i64: 1>, scalar_prefetch = 0 : i64, scratch_operands = 1 : i64, tpu.core_type = #tpu.core_type<tc>, window_params = [{transform_indices = @transform_0, window_bounds = array<i64: 2, 16, 16>}, {pipeline_mode = #tpu.pipeline_mode<synchronous>, transform_indices = @transform_1, window_bounds = array<i64: 16, 128>}, {pipeline_mode = #tpu.pipeline_mode<synchronous>, transform_indices = @transform_2, window_bounds = array<i64: 1, 128>}, {pipeline_mode = #tpu.pipeline_mode<synchronous>, transform_indices = @transform_3, window_bounds = array<i64: 384, 128>}, {pipeline_mode = #tpu.pipeline_mode<synchronous>, transform_indices = @transform_4, window_bounds = array<i64: 1, 128>}, {pipeline_mode = #tpu.pipeline_mode<synchronous>, transform_indices = @transform_5, window_bounds = array<i64: 128, 128>}, {pipeline_mode = #tpu.pipeline_mode<synchronous>, transform_indices = @transform_6, window_bounds = array<i64: 1, 128>}, {pipeline_mode = #tpu.pipeline_mode<synchronous>, transform_indices = @transform_7, window_bounds = array<i64: 16, 128>}, {transform_indices = @transform_8, window_bounds = array<i64: 2, 8, 128>}]} {
    %c0 = arith.constant 0 : index
    %c0_0 = arith.constant 0 : index
    %c0_1 = arith.constant 0 : index
    %0 = vector.load %arg1[%c0, %c0_0, %c0_1] : memref<2x16x16xf32, #tpu.memory_space<vmem>>, vector<2x16x16xf32>
    %1 = vector.shape_cast %0 : vector<2x16x16xf32> to vector<32x16xf32>
    %2 = arith.truncf %1 : vector<32x16xf32> to vector<32x16xbf16>
    %c0_2 = arith.constant 0 : index
    %c0_3 = arith.constant 0 : index
    %3 = vector.load %arg2[%c0_2, %c0_3] : memref<16x128xbf16, #tpu.memory_space<vmem>>, vector<16x128xbf16>
    %cst = arith.constant dense<0.000000e+00> : vector<32x128xf32>
    %4 = tpu.matmul %2, %3, %cst {dimension_numbers = #tpu.dot_dimension_numbers<[1], [0], [0], [1], [0, 0, 1, 1], [], []>} : vector<32x16xbf16>, vector<16x128xbf16>, vector<32x128xf32> -> vector<32x128xf32>
    %c0_4 = arith.constant 0 : index
    %c0_5 = arith.constant 0 : index
    %5 = vector.load %arg3[%c0_4, %c0_5] : memref<1x128xf32, #tpu.memory_space<vmem>>, vector<1x128xf32>
    %6 = vector.broadcast %5 : vector<1x128xf32> to vector<32x128xf32>
    %7 = arith.addf %4, %6 : vector<32x128xf32>
    %cst_6 = arith.constant 0.000000e+00 : f32
    %8 = vector.broadcast %cst_6 : f32 to vector<32x128xf32>
    %9 = arith.maximumf %7, %8 : vector<32x128xf32>
    %cst_7 = arith.constant 0.000000e+00 : f32
    %10 = vector.broadcast %cst_7 : f32 to vector<2x1x128xf32>
    %c0_8 = arith.constant 0 : index
    %c0_9 = arith.constant 0 : index
    %c0_10 = arith.constant 0 : index
    %11 = vector.load %arg10[%c0_8, %c0_9, %c0_10] : memref<2x18x128xf32, #tpu.memory_space<vmem>>, vector<2x1x128xf32>
    tpu.vector_store %arg10[%c0_8, %c0_9, %c0_10], %10 {strides = array<i32>} : memref<2x18x128xf32, #tpu.memory_space<vmem>>, vector<2x1x128xf32>,
    %c0_11 = arith.constant 0 : index
    %c17 = arith.constant 17 : index
    %c0_12 = arith.constant 0 : index
    %12 = vector.load %arg10[%c0_11, %c17, %c0_12] : memref<2x18x128xf32, #tpu.memory_space<vmem>>, vector<2x1x128xf32>
    tpu.vector_store %arg10[%c0_11, %c17, %c0_12], %10 {strides = array<i32>} : memref<2x18x128xf32, #tpu.memory_space<vmem>>, vector<2x1x128xf32>,
    %13 = vector.shape_cast %9 : vector<32x128xf32> to vector<2x16x128xf32>
    %c0_13 = arith.constant 0 : index
    %c1 = arith.constant 1 : index
    %c0_14 = arith.constant 0 : index
    %14 = vector.load %arg10[%c0_13, %c1, %c0_14] : memref<2x18x128xf32, #tpu.memory_space<vmem>>, vector<2x16x128xf32>
    tpu.vector_store %arg10[%c0_13, %c1, %c0_14], %13 {strides = array<i32>} : memref<2x18x128xf32, #tpu.memory_space<vmem>>, vector<2x16x128xf32>,
    %c0_15 = arith.constant 0 : index
    %c0_16 = arith.constant 0 : index
    %c0_17 = arith.constant 0 : index
    %15 = tpu.strided_load %arg10[%c0_15, %c0_16, %c0_17] {strides = array<i32: 1, 2, 1>} : memref<2x18x128xf32, #tpu.memory_space<vmem>>, vector<2x8x128xf32>
    %16 = arith.truncf %15 : vector<2x8x128xf32> to vector<2x8x128xbf16>
    %c0_18 = arith.constant 0 : index
    %c1_19 = arith.constant 1 : index
    %c0_20 = arith.constant 0 : index
    %17 = tpu.strided_load %arg10[%c0_18, %c1_19, %c0_20] {strides = array<i32: 1, 2, 1>} : memref<2x18x128xf32, #tpu.memory_space<vmem>>, vector<2x8x128xf32>
    %18 = arith.truncf %17 : vector<2x8x128xf32> to vector<2x8x128xbf16>
    %c0_21 = arith.constant 0 : index
    %c2 = arith.constant 2 : index
    %c0_22 = arith.constant 0 : index
    %19 = tpu.strided_load %arg10[%c0_21, %c2, %c0_22] {strides = array<i32: 1, 2, 1>} : memref<2x18x128xf32, #tpu.memory_space<vmem>>, vector<2x8x128xf32>
    %20 = arith.truncf %19 : vector<2x8x128xf32> to vector<2x8x128xbf16>
    %21 = tpu.concatenate %16, %18, %20 in 2 : vector<2x8x128xbf16>, vector<2x8x128xbf16>, vector<2x8x128xbf16> -> vector<2x8x384xbf16>
    %22 = vector.shape_cast %21 : vector<2x8x384xbf16> to vector<16x384xbf16>
    %c0_23 = arith.constant 0 : index
    %c0_24 = arith.constant 0 : index
    %23 = vector.load %arg4[%c0_23, %c0_24] : memref<384x128xbf16, #tpu.memory_space<vmem>>, vector<384x128xbf16>
    %cst_25 = arith.constant dense<0.000000e+00> : vector<16x128xf32>
    %24 = tpu.matmul %22, %23, %cst_25 {dimension_numbers = #tpu.dot_dimension_numbers<[1], [0], [0], [1], [0, 0, 1, 1], [], []>} : vector<16x384xbf16>, vector<384x128xbf16>, vector<16x128xf32> -> vector<16x128xf32>
    %c0_26 = arith.constant 0 : index
    %c0_27 = arith.constant 0 : index
    %25 = vector.load %arg5[%c0_26, %c0_27] : memref<1x128xf32, #tpu.memory_space<vmem>>, vector<1x128xf32>
    %26 = vector.broadcast %25 : vector<1x128xf32> to vector<16x128xf32>
    %27 = arith.addf %24, %26 : vector<16x128xf32>
    %cst_28 = arith.constant 0.000000e+00 : f32
    %28 = vector.broadcast %cst_28 : f32 to vector<16x128xf32>
    %29 = arith.maximumf %27, %28 : vector<16x128xf32>
    %30 = arith.truncf %29 : vector<16x128xf32> to vector<16x128xbf16>
    %c0_29 = arith.constant 0 : index
    %c0_30 = arith.constant 0 : index
    %31 = vector.load %arg6[%c0_29, %c0_30] : memref<128x128xbf16, #tpu.memory_space<vmem>>, vector<128x128xbf16>
    %cst_31 = arith.constant dense<0.000000e+00> : vector<16x128xf32>
    %32 = tpu.matmul %30, %31, %cst_31 {dimension_numbers = #tpu.dot_dimension_numbers<[1], [0], [0], [1], [0, 0, 1, 1], [], []>} : vector<16x128xbf16>, vector<128x128xbf16>, vector<16x128xf32> -> vector<16x128xf32>
    %c0_32 = arith.constant 0 : index
    %c0_33 = arith.constant 0 : index
    %33 = vector.load %arg7[%c0_32, %c0_33] : memref<1x128xf32, #tpu.memory_space<vmem>>, vector<1x128xf32>
    %34 = vector.broadcast %33 : vector<1x128xf32> to vector<16x128xf32>
    %35 = arith.addf %32, %34 : vector<16x128xf32>
    %c0_34 = arith.constant 0 : index
    %c0_35 = arith.constant 0 : index
    %c0_36 = arith.constant 0 : index
    %36 = tpu.strided_load %arg1[%c0_34, %c0_35, %c0_36] {strides = array<i32: 1, 2, 1>} : memref<2x16x16xf32, #tpu.memory_space<vmem>>, vector<2x8x16xf32>
    %37 = arith.truncf %36 : vector<2x8x16xf32> to vector<2x8x16xbf16>
    %38 = vector.shape_cast %37 : vector<2x8x16xbf16> to vector<16x16xbf16>
    %c0_37 = arith.constant 0 : index
    %c0_38 = arith.constant 0 : index
    %39 = vector.load %arg8[%c0_37, %c0_38] : memref<16x128xbf16, #tpu.memory_space<vmem>>, vector<16x128xbf16>
    %cst_39 = arith.constant dense<0.000000e+00> : vector<16x128xf32>
    %40 = tpu.matmul %38, %39, %cst_39 {dimension_numbers = #tpu.dot_dimension_numbers<[1], [0], [0], [1], [0, 0, 1, 1], [], []>} : vector<16x16xbf16>, vector<16x128xbf16>, vector<16x128xf32> -> vector<16x128xf32>
    %41 = arith.addf %35, %40 : vector<16x128xf32>
    %cst_40 = arith.constant 0.000000e+00 : f32
    %42 = vector.broadcast %cst_40 : f32 to vector<16x128xf32>
    %43 = arith.maximumf %41, %42 : vector<16x128xf32>
    %44 = vector.shape_cast %43 : vector<16x128xf32> to vector<2x8x128xf32>
    %c0_41 = arith.constant 0 : index
    %c0_42 = arith.constant 0 : index
    %c0_43 = arith.constant 0 : index
    %45 = vector.load %arg9[%c0_41, %c0_42, %c0_43] : memref<2x8x128xf32, #tpu.memory_space<vmem>>, vector<2x8x128xf32>
    tpu.vector_store %arg9[%c0_41, %c0_42, %c0_43], %44 {strides = array<i32>} : memref<2x8x128xf32, #tpu.memory_space<vmem>>, vector<2x8x128xf32>,
    return
  }
  func.func @transform_0(%arg0: i32) -> (i32, i32, i32) {
    %c0_i32 = arith.constant 0 : i32
    %c0_i32_0 = arith.constant 0 : i32
    %c0_i32_1 = arith.constant 0 : i32
    return %arg0, %c0_i32, %c0_i32_0 : i32, i32, i32
  }
  func.func @transform_1(%arg0: i32) -> (i32, i32) {
    %c0_i32 = arith.constant 0 : i32
    %c0_i32_0 = arith.constant 0 : i32
    %c0_i32_1 = arith.constant 0 : i32
    return %c0_i32, %c0_i32_0 : i32, i32
  }
  func.func @transform_2(%arg0: i32) -> (i32, i32) {
    %c0_i32 = arith.constant 0 : i32
    %c0_i32_0 = arith.constant 0 : i32
    %c0_i32_1 = arith.constant 0 : i32
    return %c0_i32, %c0_i32_0 : i32, i32
  }
  func.func @transform_3(%arg0: i32) -> (i32, i32) {
    %c0_i32 = arith.constant 0 : i32
    %c0_i32_0 = arith.constant 0 : i32
    %c0_i32_1 = arith.constant 0 : i32
    return %c0_i32, %c0_i32_0 : i32, i32
  }
  func.func @transform_4(%arg0: i32) -> (i32, i32) {
    %c0_i32 = arith.constant 0 : i32
    %c0_i32_0 = arith.constant 0 : i32
    %c0_i32_1 = arith.constant 0 : i32
    return %c0_i32, %c0_i32_0 : i32, i32
  }
  func.func @transform_5(%arg0: i32) -> (i32, i32) {
    %c0_i32 = arith.constant 0 : i32
    %c0_i32_0 = arith.constant 0 : i32
    %c0_i32_1 = arith.constant 0 : i32
    return %c0_i32, %c0_i32_0 : i32, i32
  }
  func.func @transform_6(%arg0: i32) -> (i32, i32) {
    %c0_i32 = arith.constant 0 : i32
    %c0_i32_0 = arith.constant 0 : i32
    %c0_i32_1 = arith.constant 0 : i32
    return %c0_i32, %c0_i32_0 : i32, i32
  }
  func.func @transform_7(%arg0: i32) -> (i32, i32) {
    %c0_i32 = arith.constant 0 : i32
    %c0_i32_0 = arith.constant 0 : i32
    %c0_i32_1 = arith.constant 0 : i32
    return %c0_i32, %c0_i32_0 : i32, i32
  }
  func.func @transform_8(%arg0: i32) -> (i32, i32, i32) {
    %c0_i32 = arith.constant 0 : i32
    %c0_i32_0 = arith.constant 0 : i32
    %c0_i32_1 = arith.constant 0 : i32
    return %arg0, %c0_i32, %c0_i32_0 : i32, i32, i32
  }
}

</mosaic_0001>

<bundles_post_ra>
// kernel: tpu_custom_call.1
= control target key start
LH: loop header
LB: loop body
LE: loop exit
PB: predicated region body
PF: predicated region fallthrough
CT: control target
= control target key end

     0   :  { %13 = vsyncpa [#allocation4], 0  ;;  %s1183_s0 = inlined_call_operand.hbm [shape: f32[2,16,16], index: 0, kind: input, shape index: {}]   ;;  %s1184_s1 = inlined_call_operand.hbm [shape: bf16[16,128], index: 1, kind: input, shape index: {}]   ;;  %s1185_s2 = inlined_call_operand.vmem [shape: f32[1,128], index: 2, kind: input, shape index: {}]   ;;  %s1186_s3 = inlined_call_operand.hbm [shape: bf16[384,128], index: 3, kind: input, shape index: {}]   ;;  %s1187_s4 = inlined_call_operand.vmem [shape: f32[1,128], index: 4, kind: input, shape index: {}]   ;;  %s1188_s5 = inlined_call_operand.hbm [shape: bf16[128,128], index: 5, kind: input, shape index: {}]   ;;  %s1189_s6 = inlined_call_operand.vmem [shape: f32[1,128], index: 6, kind: input, shape index: {}]   ;;  %s1190_s7 = inlined_call_operand.vmem [shape: bf16[16,128], index: 7, kind: input, shape index: {}]   ;;  %s1191_s8 = inlined_call_operand.hbm [shape: f32[2,8,128], index: 8, kind: output, shape index: {}]  }
   0x1   :  { %14 = vsyncpa [#allocation7], 0 }
   0x2   :  { %15 = vsyncpa [#allocation10], 0 }
   0x3   :  { %16 = vsyncpa [#allocation5], 0  ;;  %s1005_s27 = smov [#allocation6]   ;;  %s887_s9 = scalar_lea.hbm %s1184_s1, 128 }
   0x4   :  { %s34_s28 = sshll.u32 %s1005_s27, 4  ;;  %p888_p0 = scmp.ne.s32.totalorder %s1184_s1, %s887_s9  ;;  %s35_s28 = int_to_ptr.vmem [resolvable:$true] %s34_s28 }
   0x5   :  { %p891_p1 = scmp.lt.u32.totalorder %s887_s9, %s1184_s1 }
   0x7   :  { %p893_p2 = pnand %p891_p1, %p888_p0 }
   0x9   :  { %896 = shalt.err (!%p893_p2)
}
   0xa   :  { %s897_s14 = scalar_lea.vmem %s35_s28, 128  ;;  %p902_p4 = scmp.lt.s32.totalorder %s35_s28, %s35_s28 }
   0xb   :  { %p898_p3 = scmp.ne.s32.totalorder %s35_s28, %s897_s14  ;;  %p903_p5 = scmp.lt.s32.totalorder %s897_s14, %s897_s14 }
   0xd   :  { %p904_p6 = por %p903_p5, %p902_p4 }
   0xf   :  { %p905_p7 = pnand %p904_p6, %p898_p3 }
  0x11   :  { %908 = shalt.err (!%p905_p7)
}
  0x12   :  { %s1006_s15 = smov 64   ;;  %s1007_s16 = smov 4  }
  0x13   :  { %40 = dma.hbm_to_vmem [thread:$0]  %s1184_s1, 128, %s35_s28, [#allocation7], %s1006_s15, %s1006_s15, %s1007_s16  }
  0x14   :  { %s1008_s19 = smov [#allocation3]   ;;  %s909_s23 = scalar_lea.hbm %s1183_s0, 512 }
  0x15   :  { %s22_s20 = sshll.u32 %s1008_s19, 4  ;;  %p910_p8 = scmp.ne.s32.totalorder %s1183_s0, %s909_s23  ;;  %s23_s20 = int_to_ptr.vmem [resolvable:$true] %s22_s20 }
  0x16   :  { %p913_p9 = scmp.lt.u32.totalorder %s909_s23, %s1183_s0 }
  0x18   :  { %p915_p10 = pnand %p913_p9, %p910_p8 }
  0x1a   :  { %918 = shalt.err (!%p915_p10)
}
  0x1b   :  { %s919_s29 = scalar_lea.vmem %s23_s20, 512  ;;  %p924_p12 = scmp.lt.s32.totalorder %s23_s20, %s23_s20 }
  0x1c   :  { %p920_p11 = scmp.ne.s32.totalorder %s23_s20, %s919_s29  ;;  %p925_p13 = scmp.lt.s32.totalorder %s919_s29, %s919_s29 }
  0x1e   :  { %p926_p0 = por %p925_p13, %p924_p12 }
  0x20   :  { %p927_p1 = pnand %p926_p0, %p920_p11 }
  0x22   :  { %930 = shalt.err (!%p927_p1)
}
  0x23   :  { %s1009_s1 = smov 128   ;;  %s1010_s28 = smov 8  }
  0x24   :  { %28 = dma.hbm_to_vmem [thread:$0]  %s1183_s0, 512, %s23_s20, [#allocation4], %s1009_s1, %s1009_s1, %s1010_s28  }
  0x25   :  { %s1011_s10 = smov [#allocation8]   ;;  %s1012_s12 = smov [#allocation9]  }
  0x26   :  { %s48_s11 = sshll.u32 %s1011_s10, 4  ;;  %s62_s13 = sshll.u32 %s1012_s12, 4  ;;  %s49_s11 = int_to_ptr.vmem [resolvable:$true] %s48_s11  ;;  %s1091_s13 = int_to_ptr.vmem [resolvable:$true] %s62_s13 }
  0x27   :  { %s931_s18 = scalar_lea.hbm %s1186_s3, 3072 }
  0x28   :  { %p932_p2 = scmp.ne.s32.totalorder %s1186_s3, %s931_s18  ;;  %p935_p3 = scmp.lt.u32.totalorder %s931_s18, %s1186_s3 }
  0x2a   :  { %p937_p4 = pnand %p935_p3, %p932_p2 }
  0x2c   :  { %940 = shalt.err (!%p937_p4)
}
  0x2d   :  { %s941_s0 = scalar_lea.vmem %s49_s11, 3072  ;;  %p946_p6 = scmp.lt.s32.totalorder %s49_s11, %s49_s11 }
  0x2e   :  { %p942_p5 = scmp.ne.s32.totalorder %s49_s11, %s941_s0  ;;  %p947_p7 = scmp.lt.s32.totalorder %s941_s0, %s941_s0 }
  0x30   :  { %p948_p8 = por %p947_p7, %p946_p6 }
  0x32   :  { %p949_p9 = pnand %p948_p8, %p942_p5 }
  0x34   :  { %952 = shalt.err (!%p949_p9)
}
  0x35   :  { %54 = dma.hbm_to_vmem [thread:$0]  %s1186_s3, 3072, %s49_s11, [#allocation7], %s1006_s15, %s1006_s15, %s1007_s16  }
  0x36   :  { %s953_s27 = scalar_lea.hbm %s1188_s5, 1024 }
  0x37   :  { %p954_p10 = scmp.ne.s32.totalorder %s1188_s5, %s953_s27  ;;  %p957_p11 = scmp.lt.u32.totalorder %s953_s27, %s1188_s5 }
  0x39   :  { %p959_p12 = pnand %p957_p11, %p954_p10 }
  0x3b   :  { %962 = shalt.err (!%p959_p12)
}
  0x3c   :  { %s963_s12 = scalar_lea.vmem %s1091_s13, 1024  ;;  %p968_p0 = scmp.lt.s32.totalorder %s1091_s13, %s1091_s13 }
  0x3d   :  { %p964_p13 = scmp.ne.s32.totalorder %s1091_s13, %s963_s12  ;;  %p969_p1 = scmp.lt.s32.totalorder %s963_s12, %s963_s12 }
  0x3f   :  { %p970_p2 = por %p969_p1, %p968_p0 }
  0x41   :  { %p971_p3 = pnand %p970_p2, %p964_p13 }
  0x43   :  { %974 = shalt.err (!%p971_p3)
}
  0x44   :  { %68 = dma.hbm_to_vmem [thread:$0]  %s1188_s5, 1024, %s1091_s13, [#allocation10], %s1006_s15, %s1006_s15, %s1007_s16  }
  0x45   :  { %997 = dma.done.wait [#allocation4], 512  }
  0x46   :  { %998 = vsyncadd [#allocation4], 4294966784 }
  0x47   :  { %999 = dma.done.wait [#allocation7], 3200  }
  0x48   :  { %1000 = vsyncadd [#allocation7], 4294964096 }
  0x49   :  { %1001 = dma.done.wait [#allocation10], 1024  }
  0x4a   :  { %1002 = vsyncadd [#allocation10], 4294966272  ;;  %v1013_v0 = vmov 0.0   ;;  %v853_v1 = vld [vmem:[#allocation6] sm:$0xff]   ;;  %v87_v3 = vld [vmem:[#allocation3 + $0x8] sm:$0xff]  ;;  %vm107_vm0 = vcmask 130048  }
  0x4b   :  { %167 = vst [vmem:[#allocation2] sm:$0x1] %v1013_v0  ;;  %168 = vst [vmem:[#allocation2 + $0x18] sm:$0x1] %v1013_v0  ;;  %v86_v2 = vld [vmem:[#allocation3] sm:$0xff]  ;;  %v88_v4 = vld [vmem:[#allocation3 + $0x10] sm:$0xff]  ;;  %786 = vmatprep.subr.bf16.mxu0 %v853_v1 }
  0x4c   :  { %v90_v5 = vpack.c.bf16 %v87_v3, %v86_v2  ;;  %v89_v6 = vld [vmem:[#allocation3 + $0x18] sm:$0xff]  ;;  %787 = vmatpush3.bf16.msra.mxu0 %v853_v1  ;;  %v854_v8 = vld [vmem:[#allocation8 + $0x40] sm:$0xff]   ;;  %v857_v11 = vld [vmem:[#allocation8 + $0x48] sm:$0xff]   ;;  %vm1014_vm1 = vmmov 0   ;;  %s1015_s17 = smov [#allocation11]  }
  0x4d   :  { %v91_v7 = vpack.c.bf16 %v89_v6, %v88_v4  ;;  %792 = vmatprep.subr.bf16.mxu0 %v1013_v0  ;;  %v855_v9 = vld [vmem:[#allocation8 + $0x80] sm:$0xff]   ;;  %744 = vmatprep.subr.bf16.mxu1 %v854_v8  ;;  %v858_v12 = vld [vmem:[#allocation8 + $0x88] sm:$0xff]   ;;  %v860_v14 = vld [vmem:[#allocation8 + $0x50] sm:$0xff]   ;;  %s679_s18 = sshll.u32 %s1015_s17, 4  ;;  %s680_s18 = int_to_ptr.vmem [resolvable:$true] %s679_s18 }
  0x4e   :  { %788 = vmatprep.mubr.msk.bf16.mxu0 %vm107_vm0, %v90_v5  ;;  %v856_v10 = vld [vmem:[#allocation8] sm:$0xff]   ;;  %v859_v13 = vld [vmem:[#allocation8 + $0x8] sm:$0xff]   ;;  %v861_v15 = vld [vmem:[#allocation8 + $0x90] sm:$0xff]   ;;  %s975_s19 = scalar_lea.vmem %s680_s18, 256  ;;  %p980_p5 = scmp.lt.s32.totalorder %s680_s18, %s680_s18 }
  0x4f   :  { %789 = vmatmul.mubr.msk.bf16.vlgmr.msra.gmra.mrb[0].mxu0 %vm107_vm0, %v91_v7  ;;  %745 = vmatpush3.bf16.msra.mxu1 %v856_v10  ;;  %v862_v16 = vld [vmem:[#allocation8 + $0x10] sm:$0xff]   ;;  %v863_v17 = vld [vmem:[#allocation8 + $0x58] sm:$0xff]   ;;  %v866_v20 = vld [vmem:[#allocation8 + $0x60] sm:$0xff]   ;;  %p976_p4 = scmp.ne.s32.totalorder %s680_s18, %s975_s19  ;;  %p981_p6 = scmp.lt.s32.totalorder %s975_s19, %s975_s19 }
  0x50   :  { %793 = vmatpush3.bf16.msra.mxu0 %v855_v9  ;;  %746 = vmatprep.subr.bf16.mxu1 %v857_v11  ;;  %v864_v18 = vld [vmem:[#allocation8 + $0x98] sm:$0xff]   ;;  %v867_v21 = vld [vmem:[#allocation8 + $0xa0] sm:$0xff]   ;;  %v869_v23 = vld [vmem:[#allocation8 + $0x68] sm:$0xff]  }
  0x51   :  { %794 = vmatprep.subr.bf16.mxu0 %v1013_v0  ;;  %v865_v19 = vld [vmem:[#allocation8 + $0x18] sm:$0xff]   ;;  %v868_v22 = vld [vmem:[#allocation8 + $0x20] sm:$0xff]   ;;  %v870_v24 = vld [vmem:[#allocation8 + $0xa8] sm:$0xff]   ;;  %808 = vmatprep.mubr.msk.bf16.mxu0 %vm1014_vm1, %v1013_v0  ;;  %p982_p7 = por %p981_p6, %p980_p5 }
  0x52   :  { %v871_v25 = vld [vmem:[#allocation8 + $0x28] sm:$0xff]   ;;  %v872_v26 = vld [vmem:[#allocation8 + $0x70] sm:$0xff]   ;;  %v875_v29 = vld [vmem:[#allocation8 + $0x78] sm:$0xff]  }
  0x53   :  { %747 = vmatpush3.bf16.msra.mxu1 %v859_v13  ;;  %v873_v27 = vld [vmem:[#allocation8 + $0xb0] sm:$0xff]   ;;  %v876_v30 = vld [vmem:[#allocation8 + $0xb8] sm:$0xff]   ;;  %v693_v32 = vld [vmem:[%s1185_s2] ss:$0 sm:$0xff]  ;;  %p983_p8 = pnand %p982_p7, %p976_p4 }
  0x54   :  { %795 = vmatpush3.bf16.msra.mxu0 %v858_v12  ;;  %748 = vmatprep.subr.bf16.mxu1 %v860_v14  ;;  %v874_v28 = vld [vmem:[#allocation8 + $0x30] sm:$0xff]   ;;  %v877_v31 = vld [vmem:[#allocation8 + $0x38] sm:$0xff]   ;;  %v878_v54 = vld [vmem:[#allocation9] sm:$0xff]  }
  0x55   :  { %796 = vmatprep.subr.bf16.mxu0 %v1013_v0  ;;  %v879_v55 = vld [vmem:[#allocation9 + $0x8] sm:$0xff]   ;;  %v880_v56 = vld [vmem:[#allocation9 + $0x10] sm:$0xff]   ;;  %v881_v57 = vld [vmem:[#allocation9 + $0x18] sm:$0xff]  }
  0x56   :  { %v882_v58 = vld [vmem:[#allocation9 + $0x20] sm:$0xff]   ;;  %v883_v59 = vld [vmem:[#allocation9 + $0x28] sm:$0xff]   ;;  %v884_v60 = vld [vmem:[#allocation9 + $0x30] sm:$0xff]  }
  0x57   :  { %749 = vmatpush3.bf16.msra.mxu1 %v862_v16  ;;  %v885_v61 = vld [vmem:[%s1190_s7] sm:$0xff]   ;;  %v886_v62 = vld [vmem:[#allocation9 + $0x38] sm:$0xff]  }
  0x58   :  { %797 = vmatpush3.bf16.msra.mxu0 %v861_v15  ;;  %750 = vmatprep.subr.bf16.mxu1 %v863_v17  ;;  %v606_v63 = vld [vmem:[#allocation3] ss:$2 sm:$0xff]  ;;  %v608_v1 = vld [vmem:[#allocation3 + $0x10] ss:$2 sm:$0xff] }
  0x59   :  { %798 = vmatprep.subr.bf16.mxu0 %v1013_v0  ;;  %v740_v2 = vpack.c.bf16 %v608_v1, %v606_v63  ;;  %v697_v6 = vld [vmem:[%s1187_s4] ss:$0 sm:$0xff] }
  0x5b   :  { %751 = vmatpush3.bf16.msra.mxu1 %v865_v19 }
  0x5c   :  { %799 = vmatpush3.bf16.msra.mxu0 %v864_v18  ;;  %752 = vmatprep.subr.bf16.mxu1 %v866_v20 }
  0x5d   :  { %800 = vmatprep.subr.bf16.mxu0 %v1013_v0 }
  0x5f   :  { %753 = vmatpush3.bf16.msra.mxu1 %v868_v22 }
  0x60   :  { %801 = vmatpush3.bf16.msra.mxu0 %v867_v21  ;;  %754 = vmatprep.subr.bf16.mxu1 %v869_v23 }
  0x61   :  { %802 = vmatprep.subr.bf16.mxu0 %v1013_v0 }
  0x63   :  { %755 = vmatpush3.bf16.msra.mxu1 %v871_v25 }
  0x64   :  { %803 = vmatpush3.bf16.msra.mxu0 %v870_v24  ;;  %756 = vmatprep.subr.bf16.mxu1 %v872_v26  ;;  %v725_v24 = vld [vmem:[%s1189_s6] ss:$0 sm:$0xff] }
  0x65   :  { %804 = vmatprep.subr.bf16.mxu0 %v1013_v0 }
  0x67   :  { %757 = vmatpush3.bf16.msra.mxu1 %v874_v28 }
  0x68   :  { %805 = vmatpush3.bf16.msra.mxu0 %v873_v27  ;;  %758 = vmatprep.subr.bf16.mxu1 %v875_v29 }
  0x69   :  { %806 = vmatprep.subr.bf16.mxu0 %v1013_v0 }
  0x6b   :  { %759 = vmatpush3.bf16.msra.mxu1 %v877_v31 }
  0x6c   :  { %807 = vmatpush3.bf16.msra.mxu0 %v876_v30  ;;  %812 = vmatprep.subr.bf16.mxu1 %v1013_v0 }
  0x6d   :  { %832 = vmatprep.subr.bf16.mxu0 %v1013_v0 }
 0x122   :  { %v790_v33 = vpop.f32.mrb[0].mxu0 }
 0x123   :  { %v157_v34 = vadd.f32 %v790_v33, %v693_v32  ;;  %v148_v35 = vpop.f32.mrb[1].mxu0 }
 0x124   :  { %v149_v36 = vadd.f32 %v693_v32, %v148_v35  ;;  %v791_v37 = vpop.f32.mrb[2].mxu0 }
 0x125   :  { %v165_v38 = vmax.f32 %v157_v34, 0.0  ;;  %v160_v39 = vadd.f32 %v791_v37, %v693_v32  ;;  %v151_v40 = vpop.f32.mrb[3].mxu0 }
 0x126   :  { %v163_v41 = vmax.f32 %v149_v36, 0.0  ;;  %v152_v42 = vadd.f32 %v693_v32, %v151_v40 }
 0x127   :  { %173 = vst [vmem:[#allocation2 + $0x19] sm:$0xff] %v165_v38  ;;  %v166_v43 = vmax.f32 %v160_v39, 0.0 }
 0x128   :  { %171 = vst [vmem:[#allocation2 + $0x1] sm:$0xff] %v163_v41  ;;  %v164_v44 = vmax.f32 %v152_v42, 0.0 }
 0x129   :  { %174 = vst [vmem:[#allocation2 + $0x21] sm:$0xff] %v166_v43 }
 0x12a   :  { %172 = vst [vmem:[#allocation2 + $0x9] sm:$0xff] %v164_v44 }
 0x130   :  { %v183_v45 = vld [vmem:[#allocation2 + $0x19] ss:$2 sm:$0xff]  ;;  %v189_v46 = vld [vmem:[#allocation2 + $0x1a] ss:$2 sm:$0xff] }
 0x131   :  { %v177_v47 = vld [vmem:[#allocation2 + $0x18] ss:$2 sm:$0xff]  ;;  %v181_v48 = vld [vmem:[#allocation2 + $0x1] ss:$2 sm:$0xff] }
 0x132   :  { %v187_v49 = vld [vmem:[#allocation2 + $0x2] ss:$2 sm:$0xff]  ;;  %v738_v51 = vpack.c.bf16 %v183_v45, %v181_v48 }
 0x133   :  { %v175_v50 = vld [vmem:[#allocation2] ss:$2 sm:$0xff]  ;;  %v739_v52 = vpack.c.bf16 %v189_v46, %v187_v49 }
 0x134   :  { %v737_v53 = vpack.c.bf16 %v177_v47, %v175_v50  ;;  %441 = vmatprep.mubr.bf16.mxu1 %v738_v51 }
 0x135   :  { %809 = vmatmul.mubr.bf16.vlgmr.msra.gmra.mrb[4].mxu0 %v739_v52 }
 0x136   :  { %442 = vmatmul.mubr.bf16.vlgmr.msra.gmra.mrb[0].mxu1 %v737_v53  ;;  %834 = vmatprep.mubr.msk.bf16.mxu0 %vm1014_vm1, %v1013_v0 }
 0x137   :  { %813 = vmatpush3.bf16.msra.mxu1 %v878_v54  ;;  %828 = vmatprep.mubr.msk.bf16.mxu1 %vm1014_vm1, %v1013_v0 }
 0x138   :  { %814 = vmatprep.subr.bf16.mxu1 %v1013_v0  ;;  %833 = vmatpush3.bf16.msra.mxu0 %v885_v61 }
 0x13b   :  { %815 = vmatpush3.bf16.msra.mxu1 %v879_v55 }
 0x13c   :  { %816 = vmatprep.subr.bf16.mxu1 %v1013_v0 }
 0x13d   :  { %835 = vmatmul.mubr.msk.bf16.vlgmr.msra.gmra.mrb[8].mxu0 %vm107_vm0, %v740_v2 }
 0x13f   :  { %817 = vmatpush3.bf16.msra.mxu1 %v880_v56 }
 0x140   :  { %818 = vmatprep.subr.bf16.mxu1 %v1013_v0 }
 0x143   :  { %819 = vmatpush3.bf16.msra.mxu1 %v881_v57 }
 0x144   :  { %820 = vmatprep.subr.bf16.mxu1 %v1013_v0 }
 0x147   :  { %821 = vmatpush3.bf16.msra.mxu1 %v882_v58 }
 0x148   :  { %822 = vmatprep.subr.bf16.mxu1 %v1013_v0 }
 0x14b   :  { %823 = vmatpush3.bf16.msra.mxu1 %v883_v59 }
 0x14c   :  { %824 = vmatprep.subr.bf16.mxu1 %v1013_v0 }
 0x14f   :  { %825 = vmatpush3.bf16.msra.mxu1 %v884_v60 }
 0x150   :  { %826 = vmatprep.subr.bf16.mxu1 %v1013_v0 }
 0x153   :  { %827 = vmatpush3.bf16.msra.mxu1 %v886_v62 }
 0x208   :  { %v484_v3 = vpop.f32.mrb[4].mxu0 }
 0x209   :  { %v760_v4 = vpop.f32.mrb[0].mxu1  ;;  %v810_v5 = vpop.f32.mrb[5].mxu0 }
 0x20a   :  { %v761_v7 = vpop.f32.mrb[1].mxu1  ;;  %v487_v8 = vpop.f32.mrb[6].mxu0 }
 0x20b   :  { %v762_v9 = vadd.f32 %v761_v7, %v760_v4  ;;  %v763_v10 = vpop.f32.mrb[2].mxu1  ;;  %v811_v0 = vpop.f32.mrb[7].mxu0 }
 0x20c   :  { %v764_v11 = vpop.f32.mrb[3].mxu1 }
 0x20d   :  { %v444_v12 = vadd.f32 %v762_v9, %v697_v6  ;;  %v765_v13 = vadd.f32 %v764_v11, %v763_v10 }
 0x20f   :  { %v485_v14 = vadd.f32 %v484_v3, %v444_v12  ;;  %v447_v15 = vadd.f32 %v765_v13, %v697_v6 }
 0x210   :  { %v661_v20 = vpop.f32.mrb[8].mxu0 }
 0x211   :  { %v488_v16 = vadd.f32 %v487_v8, %v447_v15  ;;  %v491_v17 = vmax.f32 %v485_v14, 0.0  ;;  %v836_v21 = vpop.f32.mrb[9].mxu0 }
 0x212   :  { %v664_v22 = vpop.f32.mrb[10].mxu0 }
 0x213   :  { %v492_v18 = vmax.f32 %v488_v16, 0.0  ;;  %v837_v23 = vpop.f32.mrb[11].mxu0 }
 0x215   :  { %v493_v19 = vpack.c.bf16 %v492_v18, %v491_v17 }
 0x217   :  { %829 = vmatmul.mubr.bf16.vlgmr.msra.gmra.mrb[4].mxu1 %v493_v19 }
 0x2ea   :  { %v599_v25 = vpop.f32.mrb[4].mxu1 }
 0x2eb   :  { %v600_v26 = vadd.f32 %v725_v24, %v599_v25  ;;  %v830_v27 = vpop.f32.mrb[5].mxu1 }
 0x2ec   :  { %v602_v28 = vpop.f32.mrb[6].mxu1 }
 0x2ed   :  { %v668_v29 = vadd.f32 %v661_v20, %v600_v26  ;;  %v603_v30 = vadd.f32 %v725_v24, %v602_v28  ;;  %v831_v31 = vpop.f32.mrb[7].mxu1 }
 0x2ef   :  { %v670_v32 = vmax.f32 %v668_v29, 0.0  ;;  %v669_v33 = vadd.f32 %v664_v22, %v603_v30 }
 0x2f1   :  { %672 = vst [vmem:[#allocation11] sm:$0xff] %v670_v32  ;;  %v671_v34 = vmax.f32 %v669_v33, 0.0 }
 0x2f3   :  { %673 = vst [vmem:[#allocation11 + $0x8] sm:$0xff] %v671_v34 }
 0x2f4   :  { %986 = shalt.err (!%p983_p8)
}
 0x2f5   :  { %s987_s22 = scalar_lea.hbm %s1191_s8, 256 }
 0x2f6   :  { %p988_p9 = scmp.ne.s32.totalorder %s1191_s8, %s987_s22  ;;  %p991_p10 = scmp.lt.u32.totalorder %s987_s22, %s1191_s8 }
 0x2f8   :  { %p993_p11 = pnand %p991_p10, %p988_p9 }
 0x2fa   :  { %996 = shalt.err (!%p993_p11)
}
 0x2fb   :  { %685 = dma.vmem_to_hbm [thread:$0]  %s680_s18, 256, %s1191_s8, [#allocation5], %s1009_s1, %s1009_s1, %s1010_s28  }
 0x2fc   :  { %1003 = dma.done.wait [#allocation5], 256  }
 0x2fd   :  { %1004 = vsyncadd [#allocation5], 4294967040 }
 0x2fe   :  { %689 = vsyncpa [#allocation4], 1 }
 0x2ff   :  { %690 = vsyncpa [#allocation7], 1 }
 0x300   :  { %691 = vsyncpa [#allocation10], 1 }
 0x301   :  { %692 = vsyncpa [#allocation5], 1 }

</bundles_post_ra>
